<compile_context>
chip_gen: v7x
topology: tpu7x:2x2x1
jax: 0.10.0
libtpu: 0.0.40
codegen_flags: <defaults>
</compile_context>

<pallas_src>
import jax
import jax.numpy as jnp
from jax.experimental import pallas as pl
from jax.experimental.pallas import tpu as pltpu


def mlp_kernel(xT_ref, w1_ref, b1_ref, w2_ref, b2_ref, oT_ref):
    # xT_ref: (D, BM)   w1_ref: (H, D)   b1_ref: (H, 1)
    # w2_ref: (O, H)    b2_ref: (O, 1)   oT_ref: (O, BM)
    # out.T = w2 @ relu(w1 @ x.T + b1) + b2
    h = jnp.dot(w1_ref[...], xT_ref[...], preferred_element_type=jnp.float32)
    h = jnp.maximum(h + b1_ref[...], 0.0)                 # bias + ReLU in f32
    out = jnp.dot(w2_ref[...], h.astype(w2_ref.dtype),
                  preferred_element_type=jnp.float32)
    oT_ref[...] = (out + b2_ref[...]).astype(oT_ref.dtype)


def agent_forward(x_nchw, w1, b1, w2, b2, *,
                  mxu_dtype=jnp.bfloat16, block_m=256):
    """x_nchw: (B, C, H, W). w1: (hidden, in), b1: (hidden,),
    w2: (out, hidden), b2: (out,)  [PyTorch nn.Linear layout].
    Returns (B, out) float32."""
    B = x_nchw.shape[0]
    x_flat = x_nchw.reshape(B, -1)            # torch.flatten(x, start_dim=1)
    D = x_flat.shape[1]
    H = w1.shape[0]
    O = w2.shape[0]

    # Pad feature dim to a sublane multiple (zero features contribute nothing).
    D_pad = -(-D // 8) * 8
    if D_pad != D:
        x_flat = jnp.pad(x_flat, ((0, 0), (0, D_pad - D)))
        w1 = jnp.pad(w1, ((0, 0), (0, D_pad - D)))

    # Batch tile: lane/MXU aligned; pad the batch up and slice afterwards.
    bm = block_m if B > 128 else 128
    B_pad = -(-B // bm) * bm
    xT = x_flat.T                              # (D_pad, B): batch on lanes
    if B_pad != B:
        xT = jnp.pad(xT, ((0, 0), (0, B_pad - B)))
    grid = (B_pad // bm,)

    # bf16 MXU inputs (f32 accumulation inside the kernel); biases stay f32.
    xT = xT.astype(mxu_dtype)
    w1 = w1.astype(mxu_dtype)
    w2 = w2.astype(mxu_dtype)
    b1_col = b1.reshape(H, 1).astype(jnp.float32)
    b2_col = b2.reshape(O, 1).astype(jnp.float32)

    outT = pl.pallas_call(
        mlp_kernel,
        out_shape=jax.ShapeDtypeStruct((O, B_pad), jnp.float32),
        grid=grid,
        in_specs=[
            pl.BlockSpec((D_pad, bm), lambda i: (0, i)),   # batch tile of x.T
            pl.BlockSpec((H, D_pad), lambda i: (0, 0)),    # w1: VMEM-resident
            pl.BlockSpec((H, 1), lambda i: (0, 0)),        # b1
            pl.BlockSpec((O, H), lambda i: (0, 0)),        # w2: VMEM-resident
            pl.BlockSpec((O, 1), lambda i: (0, 0)),        # b2
        ],
        out_specs=pl.BlockSpec((O, bm), lambda i: (0, i)), # lane-dense (O, BM)
        compiler_params=pltpu.CompilerParams(
            dimension_semantics=("parallel",),             # v7x: 2 TCs split batch tiles
        ),
    )(xT, w1, b1_col, w2, b2_col)

    return outT.T[:B]                                      # (B, O)


if __name__ == "__main__":
    # Synthetic "env": observation_space.shape = (4, 8, 8) -> num_input = 256
    #                  action_space.shape      = (8,)      -> num_output = 8
    # Batch is sized to two 256-row MXU tiles so the kernel is actually
    # MXU-bound rather than dispatch-bound (per perf review).
    B, C, Hs, Ws = 512, 4, 8, 8
    num_input = C * Hs * Ws          # 256
    num_hidden_units = 128
    num_output = 8

    key = jax.random.PRNGKey(0)
    kx, kw1, kb1, kw2, kb2 = jax.random.split(key, 5)

    x = jax.random.normal(kx, (B, C, Hs, Ws), dtype=jnp.float32)

    # PyTorch nn.Linear layout: weight (out_features, in_features), bias (out,).
    bound1 = 1.0 / jnp.sqrt(num_input)
    w1 = jax.random.uniform(kw1, (num_hidden_units, num_input),
                            minval=-bound1, maxval=bound1, dtype=jnp.float32)
    b1 = jax.random.uniform(kb1, (num_hidden_units,),
                            minval=-bound1, maxval=bound1, dtype=jnp.float32)

    bound2 = 1.0 / jnp.sqrt(num_hidden_units)
    w2 = jax.random.uniform(kw2, (num_output, num_hidden_units),
                            minval=-bound2, maxval=bound2, dtype=jnp.float32)
    b2 = jax.random.uniform(kb2, (num_output,),
                            minval=-bound2, maxval=bound2, dtype=jnp.float32)

    out = agent_forward(x, w1, b1, w2, b2)
    out = jax.block_until_ready(out)
    assert out.shape == (B, num_output)

    # Reference in plain JAX with the same bf16-MXU / f32-accumulate recipe.
    x_flat = x.reshape(B, -1)
    xb, w1b, w2b = (a.astype(jnp.bfloat16) for a in (x_flat, w1, w2))
    h_ref = jnp.maximum(
        jnp.dot(xb, w1b.T, preferred_element_type=jnp.float32) + b1, 0.0)
    ref = jnp.dot(h_ref.astype(jnp.bfloat16), w2b.T,
                  preferred_element_type=jnp.float32) + b2
    assert jnp.allclose(out, ref, atol=1e-2, rtol=1e-2), (
        float(jnp.max(jnp.abs(out - ref))))

    print("KERNEL_OK")
</pallas_src>

<mosaic_0001>
module attributes {stable_mosaic.version = 11 : i64} {
  func.func @mlp_kernel(%arg0: i32, %arg1: memref<256x256xbf16, #tpu.memory_space<vmem>>, %arg2: memref<128x256xbf16, #tpu.memory_space<vmem>>, %arg3: memref<128x1xf32, #tpu.memory_space<vmem>>, %arg4: memref<8x128xbf16, #tpu.memory_space<vmem>>, %arg5: memref<8x1xf32, #tpu.memory_space<vmem>>, %arg6: memref<8x256xf32, #tpu.memory_space<vmem>>) attributes {dimension_semantics = [#tpu.dimension_semantics<parallel>], iteration_bounds = array<i64: 2>, scalar_prefetch = 0 : i64, scratch_operands = 0 : i64, tpu.core_type = #tpu.core_type<tc>, window_params = [{transform_indices = @transform_0, window_bounds = array<i64: 256, 256>}, {pipeline_mode = #tpu.pipeline_mode<synchronous>, transform_indices = @transform_1, window_bounds = array<i64: 128, 256>}, {pipeline_mode = #tpu.pipeline_mode<synchronous>, transform_indices = @transform_2, window_bounds = array<i64: 128, 1>}, {pipeline_mode = #tpu.pipeline_mode<synchronous>, transform_indices = @transform_3, window_bounds = array<i64: 8, 128>}, {pipeline_mode = #tpu.pipeline_mode<synchronous>, transform_indices = @transform_4, window_bounds = array<i64: 8, 1>}, {transform_indices = @transform_5, window_bounds = array<i64: 8, 256>}]} {
    %c0 = arith.constant 0 : index
    %c0_0 = arith.constant 0 : index
    %0 = vector.load %arg2[%c0, %c0_0] : memref<128x256xbf16, #tpu.memory_space<vmem>>, vector<128x256xbf16>
    %c0_1 = arith.constant 0 : index
    %c0_2 = arith.constant 0 : index
    %1 = vector.load %arg1[%c0_1, %c0_2] : memref<256x256xbf16, #tpu.memory_space<vmem>>, vector<256x256xbf16>
    %cst = arith.constant dense<0.000000e+00> : vector<128x256xf32>
    %2 = tpu.matmul %0, %1, %cst {dimension_numbers = #tpu.dot_dimension_numbers<[1], [0], [0], [1], [0, 0, 1, 1], [], []>} : vector<128x256xbf16>, vector<256x256xbf16>, vector<128x256xf32> -> vector<128x256xf32>
    %c0_3 = arith.constant 0 : index
    %c0_4 = arith.constant 0 : index
    %3 = vector.load %arg3[%c0_3, %c0_4] : memref<128x1xf32, #tpu.memory_space<vmem>>, vector<128x1xf32>
    %4 = vector.broadcast %3 : vector<128x1xf32> to vector<128x256xf32>
    %5 = arith.addf %2, %4 : vector<128x256xf32>
    %cst_5 = arith.constant 0.000000e+00 : f32
    %6 = vector.broadcast %cst_5 : f32 to vector<128x256xf32>
    %7 = arith.maximumf %5, %6 : vector<128x256xf32>
    %c0_6 = arith.constant 0 : index
    %c0_7 = arith.constant 0 : index
    %8 = vector.load %arg4[%c0_6, %c0_7] : memref<8x128xbf16, #tpu.memory_space<vmem>>, vector<8x128xbf16>
    %9 = arith.truncf %7 : vector<128x256xf32> to vector<128x256xbf16>
    %cst_8 = arith.constant dense<0.000000e+00> : vector<8x256xf32>
    %10 = tpu.matmul %8, %9, %cst_8 {dimension_numbers = #tpu.dot_dimension_numbers<[1], [0], [0], [1], [0, 0, 1, 1], [], []>} : vector<8x128xbf16>, vector<128x256xbf16>, vector<8x256xf32> -> vector<8x256xf32>
    %c0_9 = arith.constant 0 : index
    %c0_10 = arith.constant 0 : index
    %11 = vector.load %arg5[%c0_9, %c0_10] : memref<8x1xf32, #tpu.memory_space<vmem>>, vector<8x1xf32>
    %12 = vector.broadcast %11 : vector<8x1xf32> to vector<8x256xf32>
    %13 = arith.addf %10, %12 : vector<8x256xf32>
    %c0_11 = arith.constant 0 : index
    %c0_12 = arith.constant 0 : index
    %14 = vector.load %arg6[%c0_11, %c0_12] : memref<8x256xf32, #tpu.memory_space<vmem>>, vector<8x256xf32>
    tpu.vector_store %arg6[%c0_11, %c0_12], %13 {strides = array<i32>} : memref<8x256xf32, #tpu.memory_space<vmem>>, vector<8x256xf32>,
    return
  }
  func.func @transform_0(%arg0: i32) -> (i32, i32) {
    %c0_i32 = arith.constant 0 : i32
    %c0_i32_0 = arith.constant 0 : i32
    return %c0_i32, %arg0 : i32, i32
  }
  func.func @transform_1(%arg0: i32) -> (i32, i32) {
    %c0_i32 = arith.constant 0 : i32
    %c0_i32_0 = arith.constant 0 : i32
    %c0_i32_1 = arith.constant 0 : i32
    return %c0_i32, %c0_i32_0 : i32, i32
  }
  func.func @transform_2(%arg0: i32) -> (i32, i32) {
    %c0_i32 = arith.constant 0 : i32
    %c0_i32_0 = arith.constant 0 : i32
    %c0_i32_1 = arith.constant 0 : i32
    return %c0_i32, %c0_i32_0 : i32, i32
  }
  func.func @transform_3(%arg0: i32) -> (i32, i32) {
    %c0_i32 = arith.constant 0 : i32
    %c0_i32_0 = arith.constant 0 : i32
    %c0_i32_1 = arith.constant 0 : i32
    return %c0_i32, %c0_i32_0 : i32, i32
  }
  func.func @transform_4(%arg0: i32) -> (i32, i32) {
    %c0_i32 = arith.constant 0 : i32
    %c0_i32_0 = arith.constant 0 : i32
    %c0_i32_1 = arith.constant 0 : i32
    return %c0_i32, %c0_i32_0 : i32, i32
  }
  func.func @transform_5(%arg0: i32) -> (i32, i32) {
    %c0_i32 = arith.constant 0 : i32
    %c0_i32_0 = arith.constant 0 : i32
    return %c0_i32, %arg0 : i32, i32
  }
}

</mosaic_0001>

<bundles_post_ra>
// kernel: tpu_custom_call.1
= control target key start
LH: loop header
LB: loop body
LE: loop exit
PB: predicated region body
PF: predicated region fallthrough
CT: control target
= control target key end

     0   :  { %10 = vsyncpa [#allocation3], 0  ;;  %s1547_s0 = inlined_call_operand.hbm [shape: bf16[256,512], index: 0, kind: input, shape index: {}]   ;;  %s1548_s1 = inlined_call_operand.vmem [shape: bf16[128,256], index: 1, kind: input, shape index: {}]   ;;  %s1549_s2 = inlined_call_operand.vmem [shape: f32[128,1], index: 2, kind: input, shape index: {}]   ;;  %s1550_s3 = inlined_call_operand.vmem [shape: bf16[8,128], index: 3, kind: input, shape index: {}]   ;;  %s1551_s4 = inlined_call_operand.vmem [shape: f32[8,1], index: 4, kind: input, shape index: {}]   ;;  %s1552_s5 = inlined_call_operand.hbm [shape: f32[8,512], index: 5, kind: output, shape index: {}]  }
   0x1   :  { %12 = vsyncpa [#allocation3 + $0x1], 0 }
   0x2   :  { %13 = vsyncpa [#allocation4], 0 }
   0x3   :  { %15 = vsyncpa [#allocation4 + $0x1], 0  ;;  %s1248_s18 = smov 0   ;;  %s1250_s19 = smov 0  }
   0x4   :  { %s1252_s20 = smov 0   ;;  %s1254_s21 = smov 0  }
   0x5 LB: > { %s1269_s22 = sadd.s32 4294967295, %s1210_s21   ;;  %s926_s23 = sadd.s32 4294967294, %s1210_s21   ;;  %s1210_s21 = sphi %s1254_s21, %s1566_s21   ;;  %s1206_s20 = sphi %s1252_s20, %s1565_s20   ;;  %s1202_s19 = sphi %s1250_s19, %s1564_s19   ;;  %s1198_s18 = sphi %s1248_s18, %s1563_s18  }
   0x6   : > { %s1273_s24 = sadd.s32 1, %s1210_s21   ;;  %s28_s25 = sadd.s32 1, %s1206_s20 }
   0x7   : > { %s25_s26 = ssub.s32 %s1210_s21, %s1273_s24  ;;  %p35_p0 = scmp.ne.s32.totalorder %s1206_s20, %s1202_s19 }
   0x8   : > { %p26_p1 = scmp.eq.s32.totalorder %s25_s26, 0  ;;  %p36_p2 = scmp.eq.s32.totalorder %s1210_s21, 0 }
   0x9   : > { %p41_p3 = scmp.ne.s32.totalorder %s1202_s19, %s1198_s18  ;;  %p42_p4 = scmp.eq.s32.totalorder %s1269_s22, 0 }
   0xa   : > { %s1285_s27 = scalar_select %p26_p1, %s1206_s20, %s28_s25  }
   0xb   : > { %p1287_p5 = por %p36_p2, %p35_p0  ;;  %p1291_p6 = por %p42_p4, %p41_p3 }
   0xc   : > { %p149_p7 = scmp.eq.s32.totalorder %s1269_s22, 1  ;;  %p155_p8 = scmp.eq.s32.totalorder %s926_s23, 1 }
   0xd   : > { %p1002_p10 = scmp.lt.s32.totalorder %s1210_s21, 2  ;;  %s187_s7 = sand.u32 1, %s1206_s20  }
   0xe   : > { %p1298_p11 = por %p149_p7, %p35_p0  ;;  %p1302_p12 = por %p155_p8, %p41_p3 }
   0xf   : > { %s988_s8 = sshll.u32 %s1210_s21, 7  ;;  %s929_s9 = sshll.u32 %s187_s7, 8 }
  0x10   : > { %s1556_s30 = scalar_select %p1298_p11, 1, 0 }
  0x11   : > { %s1557_s6 = scalar_select %p1302_p12, 1, 0 }
  0x12   : > { %s1311_s12 = scalar_lea.hbm %s1547_s0, %s988_s8  ;;  %s191_s13 = scalar_lea.vmem [#allocation2], %s929_s9 }
  0x13   : > { %s198_s14 = sshll.u32 %s191_s13, 4  ;;  %p1315_p13 = pnand %p1002_p10, %p1287_p5  ;;  %s1319_s14 = int_to_ptr.vmem [resolvable:$true] %s198_s14 }
  0x14   : > { %s1322_s16 = scalar_lea.sflag [#allocation3], %s187_s7  ;;  %s1114_s17 = scalar_lea.hbm %s1311_s12, 4096 }
  0x15   : > { %p1115_p1 = scmp.ne.s32.totalorder %s1311_s12, %s1114_s17  ;;  %p1116_p2 = pneg %p1315_p13 }
  0x16   : > { %s1119_s26 = scalar_lea.hbm %s1547_s0, 8192  ;;  %p1120_p5 = scmp.lt.u32.totalorder %s1311_s12, %s1547_s0 }
  0x17   : > { %p1117_p3 = pnand %p1116_p2, %p1115_p1  ;;  %p1121_p7 = scmp.lt.u32.totalorder %s1119_s26, %s1114_s17 }
  0x18   : > { %p1123_p10 = scmp.lt.u32.totalorder %s1114_s17, %s1311_s12 }
  0x19   : > { %p1118_p4 = pneg %p1117_p3  ;;  %p1122_p8 = por %p1121_p7, %p1120_p5 }
  0x1b   : > { %p1124_p9 = por %p1123_p10, %p1122_p8 }
  0x1d   : > { %p1125_p0 = pnand %p1124_p9, %p1118_p4 }
  0x1f   : > { %1128 = shalt.err (!%p1125_p0)
}
  0x20   : > { %s1129_s7 = scalar_lea.vmem %s1319_s14, 4096  ;;  %s1212_s9 = smov [#allocation2]  }
  0x21   : > { %p1130_p1 = scmp.ne.s32.totalorder %s1319_s14, %s1129_s7  ;;  %s1134_s10 = sshll.u32 %s1212_s9, 4  ;;  %s1135_s10 = int_to_ptr.vmem [resolvable:$false] %s1134_s10 }
  0x22   : > { %s1136_s11 = scalar_lea.vmem %s1135_s10, 8192  ;;  %p1137_p11 = scmp.lt.s32.totalorder %s1319_s14, %s1135_s10 }
  0x23   : > { %p1132_p3 = pnand %p1130_p1, %p1116_p2  ;;  %p1138_p5 = scmp.lt.s32.totalorder %s1136_s11, %s1129_s7 }
  0x25   : > { %p1133_p12 = pneg %p1132_p3  ;;  %p1139_p7 = por %p1138_p5, %p1137_p11 }
  0x27   : > { %p1140_p8 = pnand %p1139_p7, %p1133_p12 }
  0x29   : > { %1143 = shalt.err (!%p1140_p8)
}
  0x2a   : > { %s1213_s13 = smov 256   ;;  %s1214_s17 = smov 128  }
  0x2b   : > { %s1215_s23 = smov 8   ;;  %p206_p9 = scmp.lt.s32.totalorder %s1210_s21, 3 }
  0x2c   : > { %997 = dma.hbm_to_vmem [thread:$0]  (!%p1315_p13), %s1311_s12, 4096, %s1319_s14, %s1322_s16, %s1213_s13, %s1214_s17, %s1215_s23  }
  0x2d   : > { %p1559_p0 = scmp.ge.s32.totalorder %s1210_s21, 1 }
  0x2f   : > { %p207_p2 = pnand %p1559_p0, %p206_p9 }
  0x30   : > { %s1354_s25 = sand.u32 (!%p207_p2), 1, %s1202_s19  }
  0x31   : > { %210 = sbr.rel (%p207_p2) target bundleno = 633 (0x279), region = 40  ;;  %s933_s26 = sshll.u32 (!%p207_p2), %s1354_s25, 8 }
  0x32   : > { %s213_s28 = scalar_lea.sflag (!%p207_p2), [#allocation3], %s1354_s25  ;;  %s1358_s8 = scalar_lea.vmem (!%p207_p2), [#allocation2], %s933_s26 }
  0x38   : > { %1189 = dma.done.wait (%p1291_p6), %s213_s28, 4096  }
  0x39   : > { %1191 = vsyncadd (%p1291_p6), %s213_s28, 4294963200  ;;  %v1216_v0 = vmov 0   ;;  %v1042_v1 = vld [vmem:[%s1358_s8 + $0x4] ss:$8 sps:$4 sm:$0xff]   ;;  %v1044_v2 = vld [vmem:[%s1358_s8] ss:$8 sps:$4 sm:$0xff]  }
  0x3a   : > { %1040 = vset.pattern.permute.xlu0 %v1216_v0  ;;  %1041 = vset.pattern.permute.xlu1 %v1216_v0  ;;  %v1045_v3 = vld [vmem:[%s1358_s8 + $0x14] ss:$8 sps:$4 sm:$0xff]   ;;  %v1047_v4 = vld [vmem:[%s1358_s8 + $0x10] ss:$8 sps:$4 sm:$0xff]   ;;  %v1048_v5 = vld [vmem:[%s1358_s8 + $0x24] ss:$8 sps:$4 sm:$0xff]  }
  0x3b   : > { %830 = vmatprep.mubr.bf16.mxu1 %v1216_v0  ;;  %630 = vmatprep.subr.bf16.mxu0 %v1042_v1  ;;  %v1050_v6 = vld [vmem:[%s1358_s8 + $0x20] ss:$8 sps:$4 sm:$0xff]   ;;  %v1051_v7 = vld [vmem:[%s1358_s8 + $0x34] ss:$8 sps:$4 sm:$0xff]   ;;  %v1053_v8 = vld [vmem:[%s1358_s8 + $0x30] ss:$8 sps:$4 sm:$0xff]  }
  0x3c   : > { %631 = vmatpush1.bf16.msra.mxu0 %v1044_v2  ;;  %v1054_v9 = vld [vmem:[%s1358_s8 + $0x44] ss:$8 sps:$4 sm:$0xff]   ;;  %v1056_v10 = vld [vmem:[%s1358_s8 + $0x40] ss:$8 sps:$4 sm:$0xff]   ;;  %v1057_v11 = vld [vmem:[%s1358_s8 + $0x54] ss:$8 sps:$4 sm:$0xff]  }
  0x3d   : > { %632 = vmatprep.subr.bf16.mxu0 %v1045_v3  ;;  %v1059_v12 = vld [vmem:[%s1358_s8 + $0x50] ss:$8 sps:$4 sm:$0xff]   ;;  %v1060_v13 = vld [vmem:[%s1358_s8 + $0x64] ss:$8 sps:$4 sm:$0xff]   ;;  %v1062_v15 = vld [vmem:[%s1358_s8 + $0x60] ss:$8 sps:$4 sm:$0xff]  }
  0x3e   : > { %v1092_v14 = vld [vmem:[%s1548_s1 + $0x4] ss:$8 sps:$4 sm:$0xff]   ;;  %v1063_v16 = vld [vmem:[%s1358_s8 + $0x74] ss:$8 sps:$4 sm:$0xff]   ;;  %v1065_v17 = vld [vmem:[%s1358_s8 + $0x70] ss:$8 sps:$4 sm:$0xff]  }
  0x3f   : > { %662 = vmatprep.mubr.bf16.mxu0 %v1092_v14  ;;  %v1066_v18 = vld [vmem:[%s1358_s8 + $0x84] ss:$8 sps:$4 sm:$0xff]   ;;  %v1068_v19 = vld [vmem:[%s1358_s8 + $0x80] ss:$8 sps:$4 sm:$0xff]   ;;  %v1069_v20 = vld [vmem:[%s1358_s8 + $0x94] ss:$8 sps:$4 sm:$0xff]  }
  0x40   : > { %633 = vmatpush1.bf16.msra.mxu0 %v1047_v4  ;;  %v294_v21 = vld [vmem:[%s1549_s2] sm:$0xff]  ;;  %v296_v22 = vld [vmem:[%s1549_s2 + $0x10] sm:$0xff]  ;;  %v295_v23 = vld [vmem:[%s1549_s2 + $0x8] sm:$0xff]  ;;  %s934_s17 = sshll.u32 %s1354_s25, 4  ;;  %s989_s23 = sshll.u32 %s1269_s22, 8 }
  0x41   : > { %634 = vmatprep.subr.bf16.mxu0 %v1048_v5  ;;  %312 = vperm.xlu0 %1040, %v294_v21   ;;  %v297_v24 = vld [vmem:[%s1549_s2 + $0x18] sm:$0xff]  ;;  %v1072_v26 = vld [vmem:[%s1358_s8 + $0xa4] ss:$8 sps:$4 sm:$0xff]   ;;  %v1074_v29 = vld [vmem:[%s1358_s8 + $0xa0] ss:$8 sps:$4 sm:$0xff]   ;;  %s1503_s12 = scalar_lea.hbm %s1552_s5, %s989_s23  ;;  %s842_s22 = scalar_lea.sflag [#allocation4], %s1354_s25 }
  0x42   : > { %322 = vperm.xlu1 %1041, %v296_v22   ;;  %v1071_v25 = vld [vmem:[%s1358_s8 + $0x90] ss:$8 sps:$4 sm:$0xff]   ;;  %v298_v27 = vld [vmem:[%s1549_s2 + $0x20] sm:$0xff]  ;;  %v299_v28 = vld [vmem:[%s1549_s2 + $0x28] sm:$0xff]  ;;  %p1560_p11 = scmp.ne.s32.totalorder %s1556_s30, 0  ;;  %s1217_s15 = smov [#allocation5]  }
  0x43   : > { %v1075_v30 = vld [vmem:[%s1358_s8 + $0xb4] ss:$8 sps:$4 sm:$0xff]   ;;  %v1077_v33 = vld [vmem:[%s1358_s8 + $0xb0] ss:$8 sps:$4 sm:$0xff]   ;;  %v1078_v34 = vld [vmem:[%s1358_s8 + $0xc4] ss:$8 sps:$4 sm:$0xff]  }
  0x44   : > { %635 = vmatpush1.bf16.msra.mxu0 %v1050_v6  ;;  %v300_v31 = vld [vmem:[%s1549_s2 + $0x30] sm:$0xff]  ;;  %v301_v32 = vld [vmem:[%s1549_s2 + $0x38] sm:$0xff]  ;;  %v302_v35 = vld [vmem:[%s1549_s2 + $0x40] sm:$0xff]  ;;  %s1148_s16 = sshll.u32 %s1217_s15, 4  ;;  %s1149_s16 = int_to_ptr.vmem [resolvable:$false] %s1148_s16 }
  0x45   : > { %636 = vmatprep.subr.bf16.mxu0 %v1051_v7  ;;  %317 = vperm.xlu0 %1040, %v295_v23   ;;  %v303_v36 = vld [vmem:[%s1549_s2 + $0x48] sm:$0xff]  ;;  %v1081_v38 = vld [vmem:[%s1358_s8 + $0xd4] ss:$8 sps:$4 sm:$0xff]   ;;  %v1083_v41 = vld [vmem:[%s1358_s8 + $0xd0] ss:$8 sps:$4 sm:$0xff]   ;;  %s1150_s7 = scalar_lea.vmem %s1149_s16, 512 }
  0x46   : > { %327 = vperm.xlu1 %1041, %v297_v24   ;;  %v1080_v37 = vld [vmem:[%s1358_s8 + $0xc0] ss:$8 sps:$4 sm:$0xff]   ;;  %v304_v39 = vld [vmem:[%s1549_s2 + $0x50] sm:$0xff]  ;;  %v305_v40 = vld [vmem:[%s1549_s2 + $0x58] sm:$0xff] }
  0x47   : > { %v1084_v42 = vld [vmem:[%s1358_s8 + $0xe4] ss:$8 sps:$4 sm:$0xff]   ;;  %v1086_v45 = vld [vmem:[%s1358_s8 + $0xe0] ss:$8 sps:$4 sm:$0xff]   ;;  %v1087_v46 = vld [vmem:[%s1358_s8 + $0xf4] ss:$8 sps:$4 sm:$0xff]  }
  0x48   : > { %637 = vmatpush1.bf16.msra.mxu0 %v1053_v8  ;;  %v306_v43 = vld [vmem:[%s1549_s2 + $0x60] sm:$0xff]  ;;  %v307_v44 = vld [vmem:[%s1549_s2 + $0x68] sm:$0xff]  ;;  %v308_v47 = vld [vmem:[%s1549_s2 + $0x70] sm:$0xff] }
  0x49   : > { %638 = vmatprep.subr.bf16.mxu0 %v1054_v9  ;;  %332 = vperm.xlu0 %1040, %v298_v27   ;;  %v309_v48 = vld [vmem:[%s1549_s2 + $0x78] sm:$0xff]  ;;  %v1090_v50 = vld [vmem:[%s1548_s1] ss:$8 sps:$4 sm:$0xff]   ;;  %v1096_v54 = vld [vmem:[%s1548_s1 + $0x24] ss:$8 sps:$4 sm:$0xff]  }
  0x4a   : > { %337 = vperm.xlu1 %1041, %v299_v28   ;;  %v1089_v49 = vld [vmem:[%s1358_s8 + $0xf0] ss:$8 sps:$4 sm:$0xff]   ;;  %v792_v51 = vld [vmem:[%s1551_s4] sm:$0xff]  ;;  %v1093_v52 = vld [vmem:[%s1548_s1 + $0x14] ss:$8 sps:$4 sm:$0xff]   ;;  %s242_s8 = scalar_lea.vmem [#allocation5], %s934_s17 }
  0x4b   : > { %v1095_v53 = vld [vmem:[%s1548_s1 + $0x10] ss:$8 sps:$4 sm:$0xff]   ;;  %v1098_v55 = vld [vmem:[%s1548_s1 + $0x20] ss:$8 sps:$4 sm:$0xff]   ;;  %v1099_v56 = vld [vmem:[%s1548_s1 + $0x34] ss:$8 sps:$4 sm:$0xff]  }
  0x4c   : > { %639 = vmatpush1.bf16.msra.mxu0 %v1056_v10  ;;  %v1101_v57 = vld [vmem:[%s1548_s1 + $0x30] ss:$8 sps:$4 sm:$0xff]   ;;  %v1102_v58 = vld [vmem:[%s1548_s1 + $0x44] ss:$8 sps:$4 sm:$0xff]   ;;  %v1104_v59 = vld [vmem:[%s1548_s1 + $0x40] ss:$8 sps:$4 sm:$0xff]  }
  0x4d   : > { %640 = vmatprep.subr.bf16.mxu0 %v1057_v11  ;;  %342 = vperm.xlu0 %1040, %v300_v31   ;;  %v1105_v60 = vld [vmem:[%s1548_s1 + $0x54] ss:$8 sps:$4 sm:$0xff]   ;;  %v1107_v61 = vld [vmem:[%s1548_s1 + $0x50] ss:$8 sps:$4 sm:$0xff]   ;;  %v1108_v62 = vld [vmem:[%s1548_s1 + $0x64] ss:$8 sps:$4 sm:$0xff]  }
  0x4e   : > { %347 = vperm.xlu1 %1041, %v301_v32   ;;  %v1110_v63 = vld [vmem:[%s1548_s1 + $0x60] ss:$8 sps:$4 sm:$0xff]   ;;  %v1111_v0 = vld [vmem:[%s1548_s1 + $0x74] ss:$8 sps:$4 sm:$0xff]   ;;  %v1113_v1 = vld [vmem:[%s1548_s1 + $0x70] ss:$8 sps:$4 sm:$0xff]  }
  0x4f   : > { %s856_s26 = sshll.u32 %s242_s8, 4  ;;  %s1505_s26 = int_to_ptr.vmem [resolvable:$true] %s856_s26 }
  0x50   : > { %641 = vmatpush1.bf16.msra.mxu0 %v1059_v12  ;;  %s1144_s14 = scalar_lea.vmem %s1505_s26, 256  ;;  %p1151_p4 = scmp.lt.s32.totalorder %s1505_s26, %s1149_s16 }
  0x51   : > { %642 = vmatprep.subr.bf16.mxu0 %v1060_v13  ;;  %352 = vperm.xlu0 %1040, %v302_v35   ;;  %p1145_p6 = scmp.ne.s32.totalorder %s1505_s26, %s1144_s14  ;;  %p1152_p10 = scmp.lt.s32.totalorder %s1150_s7, %s1144_s14 }
  0x52   : > { %357 = vperm.xlu1 %1041, %v303_v36  }
  0x53   : > { %p1146_p12 = pnand %p1145_p6, %p1560_p11  ;;  %p1153_p1 = por %p1152_p10, %p1151_p4 }
  0x54   : > { %643 = vmatpush1.bf16.msra.mxu0 %v1062_v15 }
  0x55   : > { %644 = vmatprep.subr.bf16.mxu0 %v1063_v16  ;;  %362 = vperm.xlu0 %1040, %v304_v39   ;;  %p1147_p13 = pneg %p1146_p12 }
  0x56   : > { %367 = vperm.xlu1 %1041, %v305_v40  }
  0x57   : > { %p1154_p3 = pnand %p1153_p1, %p1147_p13 }
  0x58   : > { %645 = vmatpush1.bf16.msra.mxu0 %v1065_v17 }
  0x59   : > { %646 = vmatprep.subr.bf16.mxu0 %v1066_v18  ;;  %372 = vperm.xlu0 %1040, %v306_v43  }
  0x5a   : > { %377 = vperm.xlu1 %1041, %v307_v44  }
  0x5c   : > { %647 = vmatpush1.bf16.msra.mxu0 %v1068_v19 }
  0x5d   : > { %648 = vmatprep.subr.bf16.mxu0 %v1069_v20  ;;  %382 = vperm.xlu0 %1040, %v308_v47  }
  0x5e   : > { %387 = vperm.xlu1 %1041, %v309_v48  }
  0x60   : > { %649 = vmatpush1.bf16.msra.mxu0 %v1071_v25 }
  0x61   : > { %650 = vmatprep.subr.bf16.mxu0 %v1072_v26  ;;  %795 = vperm.xlu0 %1040, %v792_v51  }
  0x64   : > { %651 = vmatpush1.bf16.msra.mxu0 %v1074_v29 }
  0x65   : > { %652 = vmatprep.subr.bf16.mxu0 %v1075_v30 }
  0x68   : > { %653 = vmatpush1.bf16.msra.mxu0 %v1077_v33 }
  0x69   : > { %654 = vmatprep.subr.bf16.mxu0 %v1078_v34 }
  0x6c   : > { %655 = vmatpush1.bf16.msra.mxu0 %v1080_v37 }
  0x6d   : > { %656 = vmatprep.subr.bf16.mxu0 %v1081_v38 }
  0x70   : > { %657 = vmatpush1.bf16.msra.mxu0 %v1083_v41 }
  0x71   : > { %658 = vmatprep.subr.bf16.mxu0 %v1084_v42 }
  0x74   : > { %659 = vmatpush1.bf16.msra.mxu0 %v1086_v45 }
  0x75   : > { %660 = vmatprep.subr.bf16.mxu0 %v1087_v46 }
  0x78   : > { %661 = vmatpush1.bf16.msra.mxu0 %v1089_v49 }
  0x7b   : > { %663 = vmatmul.mubr.bf16.vlgmr.msra.gmra.mrb[0].mxu0 %v1090_v50 }
  0x7c   : > { %672 = vmatprep.mubr.bf16.mxu0 %v1093_v52 }
  0x83   : > { %673 = vmatmul.mubr.bf16.gmra.mrb[4].mxu0 %v1095_v53 }
  0x84   : > { %682 = vmatprep.mubr.bf16.mxu0 %v1096_v54 }
  0x8b   : > { %683 = vmatmul.mubr.bf16.gmra.mrb[8].mxu0 %v1098_v55 }
  0x8c   : > { %692 = vmatprep.mubr.bf16.mxu0 %v1099_v56 }
  0x93   : > { %693 = vmatmul.mubr.bf16.gmra.mrb[12].mxu0 %v1101_v57 }
  0x94   : > { %702 = vmatprep.mubr.bf16.mxu0 %v1102_v58 }
  0x9b   : > { %703 = vmatmul.mubr.bf16.gmra.mrb[16].mxu0 %v1104_v59 }
  0x9c   : > { %712 = vmatprep.mubr.bf16.mxu0 %v1105_v60 }
  0xa3   : > { %713 = vmatmul.mubr.bf16.gmra.mrb[20].mxu0 %v1107_v61 }
  0xa4   : > { %722 = vmatprep.mubr.bf16.mxu0 %v1108_v62 }
  0xab   : > { %723 = vmatmul.mubr.bf16.gmra.mrb[24].mxu0 %v1110_v63 }
  0xac   : > { %732 = vmatprep.mubr.bf16.mxu0 %v1111_v0 }
  0xb3   : > { %733 = vmatmul.mubr.bf16.gmra.mrb[28].mxu0 %v1113_v1 }
  0xc0   : > { %v313_v2 = vpop.permute.xlu0 %312 }
  0xc1   : > { %v323_v11 = vpop.permute.xlu1 %322 }
  0xc4   : > { %v318_v6 = vpop.permute.xlu0 %317 }
  0xc5   : > { %v328_v22 = vpop.permute.xlu1 %327 }
  0xc8   : > { %v333_v33 = vpop.permute.xlu0 %332 }
  0xc9   : > { %v338_v38 = vpop.permute.xlu1 %337 }
  0xcc   : > { %v343_v49 = vpop.permute.xlu0 %342 }
  0xcd   : > { %v348_v54 = vpop.permute.xlu1 %347 }
  0xd0   : > { %v353_v1 = vpop.permute.xlu0 %352 }
 0x14e   : > { %v664_v3 = vpop.f32.mrb[0].mxu0 }
 0x14f   : > { %v665_v4 = vadd.f32 %v664_v3, %v313_v2  ;;  %v666_v5 = vpop.f32.mrb[1].mxu0 }
 0x150   : > { %v667_v7 = vadd.f32 %v666_v5, %v313_v2  ;;  %v668_v8 = vpop.f32.mrb[2].mxu0 }
 0x151   : > { %v669_v9 = vadd.f32 %v668_v8, %v318_v6  ;;  %v670_v10 = vpop.f32.mrb[3].mxu0  ;;  %v743_v13 = vmax.f32 %v665_v4, 0.0 }
 0x152   : > { %v671_v12 = vadd.f32 %v670_v10, %v318_v6  ;;  %v744_v15 = vmax.f32 %v667_v7, 0.0  ;;  %v358_v6 = vpop.permute.xlu1 %357 }
 0x153   : > { %v745_v14 = vmax.f32 %v669_v9, 0.0 }
 0x154   : > { %v746_v16 = vmax.f32 %v671_v12, 0.0 }
 0x155   : > { %v776_v17 = vpack.c.bf16 %v745_v14, %v743_v13 }
 0x156   : > { %v674_v18 = vpop.f32.mrb[4].mxu0  ;;  %v777_v19 = vpack.c.bf16 %v746_v16, %v744_v15 }
 0x157   : > { %v675_v20 = vadd.f32 %v674_v18, %v323_v11  ;;  %v676_v21 = vpop.f32.mrb[5].mxu0 }
 0x158   : > { %v677_v23 = vadd.f32 %v676_v21, %v323_v11  ;;  %v678_v24 = vpop.f32.mrb[6].mxu0  ;;  %798 = vmatprep.subr.bf16.mxu1 %v777_v19 }
 0x159   : > { %v679_v25 = vadd.f32 %v678_v24, %v328_v22  ;;  %v680_v26 = vpop.f32.mrb[7].mxu0  ;;  %799 = vmatpush1.bf16.msra.mxu1 %v776_v17  ;;  %v747_v28 = vmax.f32 %v675_v20, 0.0  ;;  %v363_v17 = vpop.permute.xlu0 %362 }
 0x15a   : > { %v681_v27 = vadd.f32 %v680_v26, %v328_v22  ;;  %v748_v30 = vmax.f32 %v677_v23, 0.0  ;;  %v368_v22 = vpop.permute.xlu1 %367 }
 0x15b   : > { %v749_v29 = vmax.f32 %v679_v25, 0.0 }
 0x15c   : > { %v750_v31 = vmax.f32 %v681_v27, 0.0 }
 0x15d   : > { %v778_v32 = vpack.c.bf16 %v749_v29, %v747_v28 }
 0x15e   : > { %v779_v34 = vpack.c.bf16 %v750_v31, %v748_v30  ;;  %v684_v35 = vpop.f32.mrb[8].mxu0 }
 0x15f   : > { %v685_v36 = vadd.f32 %v684_v35, %v333_v33  ;;  %v686_v37 = vpop.f32.mrb[9].mxu0 }
 0x160   : > { %v687_v39 = vadd.f32 %v686_v37, %v333_v33  ;;  %v688_v40 = vpop.f32.mrb[10].mxu0  ;;  %800 = vmatprep.subr.bf16.mxu1 %v779_v34  ;;  %v373_v33 = vpop.permute.xlu0 %372 }
 0x161   : > { %v689_v41 = vadd.f32 %v688_v40, %v338_v38  ;;  %v690_v42 = vpop.f32.mrb[11].mxu0  ;;  %801 = vmatpush1.bf16.msra.mxu1 %v778_v32  ;;  %v751_v44 = vmax.f32 %v685_v36, 0.0 }
 0x162   : > { %v691_v43 = vadd.f32 %v690_v42, %v338_v38  ;;  %v752_v46 = vmax.f32 %v687_v39, 0.0  ;;  %v378_v38 = vpop.permute.xlu1 %377 }
 0x163   : > { %v753_v45 = vmax.f32 %v689_v41, 0.0 }
 0x164   : > { %v754_v47 = vmax.f32 %v691_v43, 0.0 }
 0x165   : > { %v780_v48 = vpack.c.bf16 %v753_v45, %v751_v44 }
 0x166   : > { %v781_v50 = vpack.c.bf16 %v754_v47, %v752_v46  ;;  %v694_v51 = vpop.f32.mrb[12].mxu0 }
 0x167   : > { %v695_v52 = vadd.f32 %v694_v51, %v343_v49  ;;  %v696_v53 = vpop.f32.mrb[13].mxu0 }
 0x168   : > { %v697_v55 = vadd.f32 %v696_v53, %v343_v49  ;;  %v698_v56 = vpop.f32.mrb[14].mxu0  ;;  %802 = vmatprep.subr.bf16.mxu1 %v781_v50  ;;  %v383_v49 = vpop.permute.xlu0 %382 }
 0x169   : > { %v699_v57 = vadd.f32 %v698_v56, %v348_v54  ;;  %v700_v58 = vpop.f32.mrb[15].mxu0  ;;  %803 = vmatpush1.bf16.msra.mxu1 %v780_v48  ;;  %v755_v60 = vmax.f32 %v695_v52, 0.0 }
 0x16a   : > { %v701_v59 = vadd.f32 %v700_v58, %v348_v54  ;;  %v756_v62 = vmax.f32 %v697_v55, 0.0  ;;  %v388_v54 = vpop.permute.xlu1 %387 }
 0x16b   : > { %v757_v61 = vmax.f32 %v699_v57, 0.0 }
 0x16c   : > { %v758_v63 = vmax.f32 %v701_v59, 0.0 }
 0x16d   : > { %v782_v0 = vpack.c.bf16 %v757_v61, %v755_v60 }
 0x16e   : > { %v783_v2 = vpack.c.bf16 %v758_v63, %v756_v62  ;;  %v704_v3 = vpop.f32.mrb[16].mxu0 }
 0x16f   : > { %v705_v4 = vadd.f32 %v704_v3, %v353_v1  ;;  %v706_v5 = vpop.f32.mrb[17].mxu0  ;;  %v796_v3 = vpop.permute.xlu0 %795 }
 0x170   : > { %v707_v7 = vadd.f32 %v706_v5, %v353_v1  ;;  %v708_v8 = vpop.f32.mrb[18].mxu0  ;;  %804 = vmatprep.subr.bf16.mxu1 %v783_v2  ;;  %v775_v2 = vld [vmem:[%s1550_s3] sm:$0xf] }
 0x171   : > { %v709_v9 = vadd.f32 %v708_v8, %v358_v6  ;;  %v710_v10 = vpop.f32.mrb[19].mxu0  ;;  %805 = vmatpush1.bf16.msra.mxu1 %v782_v0  ;;  %v759_v12 = vmax.f32 %v705_v4, 0.0 }
 0x172   : > { %v711_v11 = vadd.f32 %v710_v10, %v358_v6  ;;  %v760_v14 = vmax.f32 %v707_v7, 0.0 }
 0x173   : > { %v761_v13 = vmax.f32 %v709_v9, 0.0 }
 0x174   : > { %v762_v15 = vmax.f32 %v711_v11, 0.0 }
 0x175   : > { %v784_v16 = vpack.c.bf16 %v761_v13, %v759_v12 }
 0x176   : > { %v785_v18 = vpack.c.bf16 %v762_v15, %v760_v14  ;;  %v714_v19 = vpop.f32.mrb[20].mxu0 }
 0x177   : > { %v715_v20 = vadd.f32 %v714_v19, %v363_v17  ;;  %v716_v21 = vpop.f32.mrb[21].mxu0 }
 0x178   : > { %v717_v23 = vadd.f32 %v716_v21, %v363_v17  ;;  %v718_v24 = vpop.f32.mrb[22].mxu0  ;;  %806 = vmatprep.subr.bf16.mxu1 %v785_v18 }
 0x179   : > { %v719_v25 = vadd.f32 %v718_v24, %v368_v22  ;;  %v720_v26 = vpop.f32.mrb[23].mxu0  ;;  %807 = vmatpush1.bf16.msra.mxu1 %v784_v16  ;;  %v763_v28 = vmax.f32 %v715_v20, 0.0 }
 0x17a   : > { %v721_v27 = vadd.f32 %v720_v26, %v368_v22  ;;  %v764_v30 = vmax.f32 %v717_v23, 0.0 }
 0x17b   : > { %v765_v29 = vmax.f32 %v719_v25, 0.0 }
 0x17c   : > { %v766_v31 = vmax.f32 %v721_v27, 0.0 }
 0x17d   : > { %v786_v32 = vpack.c.bf16 %v765_v29, %v763_v28 }
 0x17e   : > { %v787_v34 = vpack.c.bf16 %v766_v31, %v764_v30  ;;  %v724_v35 = vpop.f32.mrb[24].mxu0 }
 0x17f   : > { %v725_v36 = vadd.f32 %v724_v35, %v373_v33  ;;  %v726_v37 = vpop.f32.mrb[25].mxu0 }
 0x180   : > { %v727_v39 = vadd.f32 %v726_v37, %v373_v33  ;;  %v728_v40 = vpop.f32.mrb[26].mxu0  ;;  %808 = vmatprep.subr.bf16.mxu1 %v787_v34 }
 0x181   : > { %v729_v41 = vadd.f32 %v728_v40, %v378_v38  ;;  %v730_v42 = vpop.f32.mrb[27].mxu0  ;;  %809 = vmatpush1.bf16.msra.mxu1 %v786_v32  ;;  %v767_v44 = vmax.f32 %v725_v36, 0.0 }
 0x182   : > { %v731_v43 = vadd.f32 %v730_v42, %v378_v38  ;;  %v768_v46 = vmax.f32 %v727_v39, 0.0 }
 0x183   : > { %v769_v45 = vmax.f32 %v729_v41, 0.0 }
 0x184   : > { %v770_v47 = vmax.f32 %v731_v43, 0.0 }
 0x185   : > { %v788_v48 = vpack.c.bf16 %v769_v45, %v767_v44 }
 0x186   : > { %v789_v50 = vpack.c.bf16 %v770_v47, %v768_v46  ;;  %v734_v51 = vpop.f32.mrb[28].mxu0 }
 0x187   : > { %v735_v52 = vadd.f32 %v734_v51, %v383_v49  ;;  %v736_v53 = vpop.f32.mrb[29].mxu0 }
 0x188   : > { %v737_v55 = vadd.f32 %v736_v53, %v383_v49  ;;  %v738_v56 = vpop.f32.mrb[30].mxu0  ;;  %810 = vmatprep.subr.bf16.mxu1 %v789_v50 }
 0x189   : > { %v739_v57 = vadd.f32 %v738_v56, %v388_v54  ;;  %v740_v58 = vpop.f32.mrb[31].mxu0  ;;  %811 = vmatpush1.bf16.msra.mxu1 %v788_v48  ;;  %v771_v60 = vmax.f32 %v735_v52, 0.0 }
 0x18a   : > { %v741_v59 = vadd.f32 %v740_v58, %v388_v54  ;;  %v772_v62 = vmax.f32 %v737_v55, 0.0 }
 0x18b   : > { %v773_v61 = vmax.f32 %v739_v57, 0.0 }
 0x18c   : > { %v774_v63 = vmax.f32 %v741_v59, 0.0 }
 0x18d   : > { %v790_v0 = vpack.c.bf16 %v773_v61, %v771_v60 }
 0x18e   : > { %v791_v1 = vpack.c.bf16 %v774_v63, %v772_v62 }
 0x190   : > { %812 = vmatprep.subr.bf16.mxu1 %v791_v1 }
 0x191   : > { %813 = vmatpush1.bf16.msra.mxu1 %v790_v0 }
 0x194   : > { %831 = vmatmul.mubr.bf16.vlgmr.msra.gmra.mrb[0].mxu1 %v775_v2 }
 0x267   : > { %v832_v4 = vpop.f32.mrb[0].mxu1 }
 0x268   : > { %v833_v5 = vadd.f32 %v832_v4, %v796_v3  ;;  %v834_v6 = vpop.f32.mrb[1].mxu1 }
 0x269   : > { %v835_v7 = vadd.f32 %v834_v6, %v796_v3  ;;  %v836_v8 = vpop.f32.mrb[2].mxu1 }
 0x26a   : > { %839 = vst [vmem:[%s242_s8] sm:$0xff] %v833_v5  ;;  %v837_v9 = vpop.f32.mrb[3].mxu1 }
 0x26b   : > { %840 = vst [vmem:[%s242_s8 + $0x8] sm:$0xff] %v835_v7 }
 0x26c   : > { %1157 = shalt.err (!%p1154_p3)
}
 0x26d   : > { %s1158_s25 = scalar_lea.hbm %s1503_s12, 256  ;;  %s1162_s11 = scalar_lea.hbm %s1552_s5, 512 }
 0x26e   : > { %p1159_p5 = scmp.ne.s32.totalorder %s1503_s12, %s1158_s25  ;;  %p1163_p9 = scmp.lt.u32.totalorder %s1503_s12, %s1552_s5 }
 0x26f   : > { %p1164_p0 = scmp.lt.u32.totalorder %s1162_s11, %s1158_s25  ;;  %p1166_p6 = scmp.lt.u32.totalorder %s1158_s25, %s1503_s12 }
 0x270   : > { %p1160_p7 = pnand %p1159_p5, %p1560_p11 }
 0x271   : > { %p1165_p2 = por %p1164_p0, %p1163_p9 }
 0x272   : > { %p1161_p8 = pneg %p1160_p7 }
 0x273   : > { %p1167_p12 = por %p1166_p6, %p1165_p2 }
 0x275   : > { %p1168_p13 = pnand %p1167_p12, %p1161_p8 }
 0x277   : > { %1171 = shalt.err (!%p1168_p13)
}
 0x278   : > { %992 = dma.vmem_to_hbm [thread:$0]  (%p1560_p11), %s1505_s26, 256, %s1503_s12, %s842_s22  }
 0x279 PF: > { %s868_s23 = sand.u32 1, %s1198_s18   ;;  %p1561_p4 = scmp.ne.s32.totalorder %s1557_s6, 0 }
 0x27a   : > { %p1562_p10 = scmp.ge.s32.totalorder %s1210_s21, 2  ;;  %s869_s8 = scalar_lea.sflag [#allocation4], %s868_s23 }
 0x27c   : > { %p999_p1 = pnand %p1562_p10, %p1561_p4 }
 0x27e   : > { %1193 = dma.done.wait (!%p999_p1), %s869_s8, 256  }
 0x27f   : > { %1195 = vsyncadd (!%p999_p1), %s869_s8, 4294967040  ;;  %p18_p3 = scmp.ge.s32.totalorder %s1273_s24, 4   ;;  %s1563_s18 = smov %s1202_s19 }
 0x280   : > { %s1564_s19 = smov %s1206_s20  ;;  %s1565_s20 = smov %s1285_s27 }
 0x281   : > { %s1566_s21 = smov %s1273_s24  ;;  %20 = sbr.rel (!%p18_p3) target bundleno = 5 (0x5), region = 85 }
 0x288   :  { %874 = vsyncpa [#allocation3], 1 }
 0x289   :  { %876 = vsyncpa [#allocation3 + $0x1], 1 }
 0x28a   :  { %877 = vsyncpa [#allocation4], 1 }
 0x28b   :  { %879 = vsyncpa [#allocation4 + $0x1], 1 }

</bundles_post_ra>
